<compile_context>
chip_gen: v7x
topology: tpu7x:2x2x1
jax: 0.10.0
libtpu: 0.0.40
codegen_flags: <defaults>
</compile_context>

<pallas_src>
import jax
import jax.numpy as jnp
import numpy as np
from jax.experimental import pallas as pl
from jax.experimental.pallas import tpu as pltpu


def _round_up(x, m):
    return (x + m - 1) // m * m


def _vmem_limit_bytes(need_bytes):
    # Generation-aware scoped-VMEM limit: up to 75% of physical VMEM
    # (128 MiB on v5e/v6e -> 96 MiB, 64 MiB on v7x -> 48 MiB).
    try:
        cap = int(pltpu.get_tpu_info().vmem_capacity_bytes)
    except Exception:
        cap = 64 << 20  # conservative fallback (smallest generation, v7x)
    return int(min(max(need_bytes, 4 << 20), (cap * 3) // 4))


def _choose_tile_n(n, v_pad):
    # ~4 MiB of f32 logits per step amortizes the ~0.35us/step overhead; cap at
    # 1024 rows (benefit flattens past ~512).  Multiples of 16 for bf16 packing.
    budget_rows = max(256, (4 << 20) // (4 * v_pad))
    t = int(min(1024, budget_rows))
    if n < t:
        t = _round_up(max(n, 16), 16)
    return t


# --------------------------------------------------------------------------- #
# Training path: tiled bf16 one-hot matmul + fused CE with precomputed lse.
# --------------------------------------------------------------------------- #
def _train_kernel(x_ref, tgt_ref, emb_ref, lse_ref, logits_ref, psum_ref, pcnt_ref):
    tile_n, v_pad = logits_ref.shape
    tokens = x_ref[...]                          # (tile_n, 1) int32
    targets = tgt_ref[...]                       # (tile_n, 1) int32
    col = jax.lax.broadcasted_iota(jnp.int32, (tile_n, v_pad), 1)

    # Embedding lookup as a one-hot matmul on the MXU (bf16 operands, f32 acc).
    one_hot = (col == tokens).astype(jnp.bfloat16)
    logits = jnp.dot(one_hot, emb_ref[...], preferred_element_type=jnp.float32)
    logits_ref[...] = logits.astype(logits_ref.dtype)

    # Cross-entropy with ignore_index = -1.  Logits rows are embedding rows, so
    # logsumexp depends only on the token id: gather the precomputed per-row
    # logsumexp with a select instead of max/exp/log over the full tile.
    lse = jnp.sum(jnp.where(col == tokens, lse_ref[...], 0.0),
                  axis=-1, keepdims=True)                        # (tile_n, 1)
    tgt_logit = jnp.sum(jnp.where(col == targets, logits, 0.0),
                        axis=-1, keepdims=True)                  # (tile_n, 1)
    valid = (targets != -1).astype(jnp.float32)                  # (tile_n, 1)

    # Per-tile partials; the scalar mean is finished outside the kernel so the
    # grid axis stays "parallel" (no carried accumulator, no revisited block).
    psum_ref[...] = jnp.sum(valid * (lse - tgt_logit), axis=0,
                            keepdims=True).reshape(1, 1, 1)
    pcnt_ref[...] = jnp.sum(valid, axis=0, keepdims=True).reshape(1, 1, 1)


def _run_train(emb_bf16, lse_row, x_col, tgt_col, tile_n, logits_dtype):
    n_pad = x_col.shape[0]
    v_pad = emb_bf16.shape[0]
    n_tiles = n_pad // tile_n
    need = (2 * v_pad * v_pad * 2          # resident bf16 table, double-buffered
            + 8 * tile_n * v_pad * 4        # logits tile buffers + temporaries
            + 8 * tile_n * 128 * 4          # (tile_n,1) int32 blocks pad to 128 lanes
            + (1 << 20))
    cost = pl.CostEstimate(
        flops=2 * n_pad * v_pad * v_pad,
        transcendentals=0,
        bytes_accessed=(n_pad * v_pad * jnp.dtype(logits_dtype).itemsize  # logits
                        + v_pad * v_pad * 2                               # emb
                        + v_pad * 4                                       # lse
                        + 2 * n_pad * 4                                   # tokens+targets
                        + 2 * n_tiles * 4),                               # partials
    )
    return pl.pallas_call(
        _train_kernel,
        out_shape=(
            jax.ShapeDtypeStruct((n_pad, v_pad), logits_dtype),
            jax.ShapeDtypeStruct((n_tiles, 1, 1), jnp.float32),
            jax.ShapeDtypeStruct((n_tiles, 1, 1), jnp.float32),
        ),
        grid_spec=pltpu.PrefetchScalarGridSpec(
            num_scalar_prefetch=0,
            grid=(n_tiles,),
            in_specs=[
                pl.BlockSpec((tile_n, 1), lambda i: (i, 0)),        # tokens
                pl.BlockSpec((tile_n, 1), lambda i: (i, 0)),        # targets
                pl.BlockSpec((v_pad, v_pad), lambda i: (0, 0)),     # emb (resident, bf16)
                pl.BlockSpec((1, v_pad), lambda i: (0, 0)),         # per-row logsumexp
            ],
            out_specs=(
                pl.BlockSpec((tile_n, v_pad), lambda i: (i, 0)),    # logits
                pl.BlockSpec((1, 1, 1), lambda i: (i, 0, 0)),       # partial CE sum
                pl.BlockSpec((1, 1, 1), lambda i: (i, 0, 0)),       # partial valid count
            ),
        ),
        compiler_params=pltpu.CompilerParams(
            dimension_semantics=("parallel",),                      # megacore-shardable
            vmem_limit_bytes=_vmem_limit_bytes(need),
        ),
        cost_estimate=cost,
    )(x_col, tgt_col, emb_bf16, lse_row)


# --------------------------------------------------------------------------- #
# Inference path: scalar-prefetch-driven DMA row gather (no MXU, no residency).
# --------------------------------------------------------------------------- #
def _gather_kernel(tok_ref, emb_ref, o_ref):
    # tok_ref (SMEM scalar prefetch) only drives the index_maps; body is a copy.
    del tok_ref
    o_ref[...] = emb_ref[...].astype(o_ref.dtype)


def _run_gather(emb3, tok_ids, logits_dtype):
    n = tok_ids.shape[0]
    v_pad = emb3.shape[0]
    cost = pl.CostEstimate(
        flops=0, transcendentals=0,
        bytes_accessed=(n * v_pad * 4
                        + n * v_pad * jnp.dtype(logits_dtype).itemsize
                        + n * 4),
    )
    return pl.pallas_call(
        _gather_kernel,
        out_shape=jax.ShapeDtypeStruct((n, 1, v_pad), logits_dtype),
        grid_spec=pltpu.PrefetchScalarGridSpec(
            num_scalar_prefetch=1,              # token ids -> SMEM, drive index_maps
            grid=(n,),
            in_specs=[
                # emb viewed as (V_pad, 1, V_pad): the gathered (row) axis is not
                # one of the two minormost dims, so a single-row block satisfies
                # the (8,128) tiling rules.  Only 2 rows ever live in VMEM.
                pl.BlockSpec((1, 1, v_pad), lambda i, tok: (tok[i], 0, 0)),
            ],
            out_specs=pl.BlockSpec((1, 1, v_pad), lambda i, tok: (i, 0, 0)),
        ),
        compiler_params=pltpu.CompilerParams(
            dimension_semantics=("parallel",),
            vmem_limit_bytes=_vmem_limit_bytes(4 << 20),
        ),
        cost_estimate=cost,
    )(tok_ids, emb3)


# --------------------------------------------------------------------------- #
# Wrapper matching Bigram.forward semantics.
# --------------------------------------------------------------------------- #
def bigram_forward(emb, x, targets=None, *, tile_n=None, logits_dtype=jnp.float32):
    """emb: (V, V) f32 table, x: (B, T) int token ids.

    targets None  -> (logits (B, T, V), None)
    targets given -> (logits (B*T, V), scalar mean CE loss with ignore_index=-1)
    """
    B, T = x.shape
    V = emb.shape[0]
    N = B * T
    v_pad = _round_up(V, 128)

    emb_p = emb.astype(jnp.float32)
    if v_pad != V:
        emb_p = jnp.pad(emb_p, ((0, v_pad - V), (0, v_pad - V)))

    if targets is None:
        # Pure DMA row gather; exact f32 rows of the table.
        tok_ids = x.reshape(N).astype(jnp.int32)
        emb3 = emb_p.reshape(v_pad, 1, v_pad)
        out = _run_gather(emb3, tok_ids, logits_dtype)
        return out.reshape(N, v_pad)[:, :V].reshape(B, T, V), None

    if tile_n is None:
        tile_n = _choose_tile_n(N, v_pad)
    tile_n = max(16, _round_up(int(tile_n), 16))
    n_pad = _round_up(max(N, tile_n), tile_n)

    x_col = jnp.zeros((n_pad, 1), jnp.int32).at[:N, 0].set(
        x.reshape(N).astype(jnp.int32))
    tgt_col = jnp.full((n_pad, 1), -1, jnp.int32).at[:N, 0].set(
        targets.reshape(N).astype(jnp.int32))

    # Per-vocab-row logsumexp, precomputed once (logits rows ARE embedding rows).
    lse_row = jnp.zeros((1, v_pad), jnp.float32).at[0, :V].set(
        jax.nn.logsumexp(emb.astype(jnp.float32), axis=-1))
    emb_bf16 = emb_p.astype(jnp.bfloat16)

    logits_flat, psum, pcnt = _run_train(emb_bf16, lse_row, x_col, tgt_col,
                                         tile_n, logits_dtype)
    # Mean over non-ignored targets.  If every target is -1 this is 0/0 = NaN,
    # matching PyTorch F.cross_entropy.
    loss = jnp.sum(psum) / jnp.sum(pcnt)
    return logits_flat[:N, :V], loss


if __name__ == "__main__":
    B, T, V = 2, 8, 128

    key = jax.random.PRNGKey(0)
    k_emb, k_x, k_tgt, k_x2, k_t2 = jax.random.split(key, 5)

    emb = jax.random.normal(k_emb, (V, V), dtype=jnp.float32)   # nn.Embedding ~ N(0,1)
    x = jax.random.randint(k_x, (B, T), 0, V, dtype=jnp.int32)
    targets = jax.random.randint(k_tgt, (B, T), 0, V, dtype=jnp.int32)
    targets = targets.at[0, 0].set(-1)                          # exercise ignore_index

    def ref_ce(xa, ta):
        lg = jnp.take(emb, xa.reshape(-1), axis=0)
        lse = jax.nn.logsumexp(lg, axis=-1)
        tf = ta.reshape(-1)
        ok = tf != -1
        tl = jnp.take_along_axis(lg, jnp.clip(tf, 0, V - 1)[:, None], axis=1)[:, 0]
        return lg, jnp.sum(jnp.where(ok, lse - tl, 0.0)) / jnp.sum(ok.astype(jnp.float32))

    ref_logits, ref_loss = ref_ce(x, targets)

    # Inference path (no targets) -> DMA row-gather kernel (exact f32 rows).
    logits_infer, loss_none = bigram_forward(emb, x, None)
    assert logits_infer.shape == (B, T, V) and loss_none is None

    # Training path, single-tile grid.
    logits_train, loss = bigram_forward(emb, x, targets)
    assert logits_train.shape == (B * T, V) and loss.shape == ()

    # Training path, multi-tile grid (4 tiles) -> exercises the parallel
    # per-tile partial (sum, count) reduction finished in JAX.
    B2, T2 = 4, 16
    x2 = jax.random.randint(k_x2, (B2, T2), 0, V, dtype=jnp.int32)
    targets2 = jax.random.randint(k_t2, (B2, T2), 0, V, dtype=jnp.int32)
    targets2 = targets2.at[1, 3].set(-1)
    ref_logits2, ref_loss2 = ref_ce(x2, targets2)
    logits_train2, loss2 = bigram_forward(emb, x2, targets2, tile_n=16)

    jax.block_until_ready((logits_infer, logits_train, loss, logits_train2, loss2))

    # Gather path is exact; training logits are bf16-rounded embedding rows.
    np.testing.assert_allclose(np.asarray(logits_infer.reshape(B * T, V)),
                               np.asarray(ref_logits), rtol=1e-6, atol=1e-6)
    np.testing.assert_allclose(np.asarray(logits_train), np.asarray(ref_logits),
                               rtol=5e-2, atol=5e-2)
    np.testing.assert_allclose(np.asarray(loss), np.asarray(ref_loss),
                               rtol=5e-2, atol=5e-2)
    np.testing.assert_allclose(np.asarray(logits_train2), np.asarray(ref_logits2),
                               rtol=5e-2, atol=5e-2)
    np.testing.assert_allclose(np.asarray(loss2), np.asarray(ref_loss2),
                               rtol=5e-2, atol=5e-2)

    print("KERNEL_OK")
</pallas_src>

<mosaic_0001>
module attributes {stable_mosaic.version = 11 : i64} {
  func.func @_gather_kernel(%arg0: i32, %arg1: memref<16xi32, #tpu.memory_space<smem>>, %arg2: memref<1x1x128xf32, #tpu.memory_space<vmem>>, %arg3: memref<1x1x128xf32, #tpu.memory_space<vmem>>) attributes {dimension_semantics = [#tpu.dimension_semantics<parallel>], iteration_bounds = array<i64: 16>, scalar_prefetch = 1 : i64, scratch_operands = 0 : i64, tpu.core_type = #tpu.core_type<tc>, window_params = [{transform_indices = @transform_0, window_bounds = array<i64: 1, 1, 128>}, {transform_indices = @transform_1, window_bounds = array<i64: 1, 1, 128>}]} {
    %c0 = arith.constant 0 : index
    %c0_0 = arith.constant 0 : index
    %c0_1 = arith.constant 0 : index
    %0 = vector.load %arg2[%c0, %c0_0, %c0_1] : memref<1x1x128xf32, #tpu.memory_space<vmem>>, vector<1x1x128xf32>
    %c0_2 = arith.constant 0 : index
    %c0_3 = arith.constant 0 : index
    %c0_4 = arith.constant 0 : index
    %1 = vector.load %arg3[%c0_2, %c0_3, %c0_4] : memref<1x1x128xf32, #tpu.memory_space<vmem>>, vector<1x1x128xf32>
    tpu.vector_store %arg3[%c0_2, %c0_3, %c0_4], %0 {strides = array<i32>} : memref<1x1x128xf32, #tpu.memory_space<vmem>>, vector<1x1x128xf32>,
    return
  }
  func.func @transform_0(%arg0: i32, %arg1: memref<16xi32, #tpu.memory_space<smem>>) -> (i32, i32, i32) {
    %0 = arith.index_cast %arg0 : i32 to index
    %1 = memref.load %arg1[%0] : memref<16xi32, #tpu.memory_space<smem>>
    %c0_i32 = arith.constant 0 : i32
    %c0_i32_0 = arith.constant 0 : i32
    %c0_i32_1 = arith.constant 0 : i32
    return %1, %c0_i32, %c0_i32_0 : i32, i32, i32
  }
  func.func @transform_1(%arg0: i32, %arg1: memref<16xi32, #tpu.memory_space<smem>>) -> (i32, i32, i32) {
    %c0_i32 = arith.constant 0 : i32
    %c0_i32_0 = arith.constant 0 : i32
    %c0_i32_1 = arith.constant 0 : i32
    return %arg0, %c0_i32, %c0_i32_0 : i32, i32, i32
  }
}

</mosaic_0001>

<bundles_post_ra>
// kernel: tpu_custom_call.1
= control target key start
LH: loop header
LB: loop body
LE: loop exit
PB: predicated region body
PF: predicated region fallthrough
CT: control target
= control target key end

     0   :  { %s654_s0 = inlined_call_operand.hbm [shape: s32[16], index: 0, kind: input, shape index: {}]   ;;  %s655_s1 = inlined_call_operand.hbm [shape: f32[128,1,128], index: 1, kind: input, shape index: {}]   ;;  %s656_s2 = inlined_call_operand.hbm [shape: f32[16,1,128], index: 2, kind: output, shape index: {}]  }
   0x1   :  { %s298_s11 = scalar_lea.hbm %s654_s0, 16 }
   0x2   :  { %p299_p0 = scmp.ne.s32.totalorder %s654_s0, %s298_s11  ;;  %p302_p1 = scmp.lt.u32.totalorder %s298_s11, %s654_s0 }
   0x4   :  { %p304_p2 = pnand %p302_p1, %p299_p0 }
   0x6   :  { %307 = shalt.err (!%p304_p2)  }
   0x7   :  { %s432_s16 = smov [#allocation3]  }
   0x8   :  { %8 = dma.hbm_to_smem %s654_s0, 16, %s432_s16, [#allocation2] }
   0x9   :  { %394 = dma.done.wait [#allocation2], 16 }
   0xa   :  { %395 = vsyncadd [#allocation2], 4294967280 }
   0xb   :  { %10 = sfence }
   0xc   :  { %11 = vsyncpa [#allocation5], 0 }
   0xd   :  { %13 = vsyncpa [#allocation5 + $0x1], 0 }
   0xe   :  { %14 = vsyncpa [#allocation6], 0 }
   0xf   :  { %16 = vsyncpa [#allocation6 + $0x1], 0  ;;  %s462_s19 = smov 0   ;;  %s464_s20 = smov 0  }
  0x10   :  { %s466_s21 = smov 0   ;;  %s468_s22 = smov 0  }
  0x11   :  { %s470_s23 = smov 0   ;;  %s472_s24 = smov 0  }
  0x12   :  { %s474_s0 = smov 0  }
  0x13 LB: > { %s496_s25 = sadd.s32 4294967295, %s430_s0   ;;  %s215_s26 = sadd.s32 4294967294, %s430_s0   ;;  %s430_s0 = sphi %s474_s0, %s674_s0   ;;  %s426_s24 = sphi %s472_s24, %s673_s24   ;;  %s422_s23 = sphi %s470_s23, %s672_s23   ;;  %s418_s22 = sphi %s468_s22, %s671_s22   ;;  %s414_s21 = sphi %s466_s21, %s670_s21   ;;  %s410_s20 = sphi %s464_s20, %s669_s20   ;;  %s406_s19 = sphi %s462_s19, %s668_s19  }
  0x14   : > { %s500_s27 = sadd.s32 1, %s430_s0   ;;  %s26_s28 = sld [smem:[#allocation3 + %s430_s0]] }
  0x15   : > { %s27_s29 = sld [smem:[#allocation3 + %s500_s27]]  ;;  %s31_s30 = sadd.s32 1, %s426_s24 }
  0x16   : > { %p38_p3 = scmp.ne.s32.totalorder %s426_s24, %s422_s23  ;;  %p39_p4 = scmp.eq.s32.totalorder %s430_s0, 0 }
  0x17   : > { %p44_p5 = scmp.ne.s32.totalorder %s422_s23, %s418_s22  ;;  %p45_p6 = scmp.eq.s32.totalorder %s496_s25, 0 }
  0x18   : > { %p510_p7 = por %p39_p4, %p38_p3  ;;  %s54_s4 = ssub.s32 %s430_s0, %s500_s27 }
  0x19   : > { %p516_p8 = por %p45_p6, %p44_p5  ;;  %p55_p9 = scmp.eq.s32.totalorder %s54_s4, 0 }
  0x1a   : > { %s57_s6 = sadd.s32 1, %s414_s21  ;;  %p67_p10 = scmp.ne.s32.totalorder %s414_s21, %s410_s20 }
  0x1b   : > { %s660_s5 = scalar_select %p516_p8, 1, 0 }
  0x1c   : > { %s28_s7 = ssub.s32 %s26_s28, %s27_s29  ;;  %p68_p11 = scmp.eq.s32.totalorder %s496_s25, 15 }
  0x1d   : > { %p29_p12 = scmp.eq.s32.totalorder %s28_s7, 0  ;;  %p73_p13 = scmp.ne.s32.totalorder %s410_s20, %s406_s19 }
  0x1e   : > { %s527_s8 = scalar_select %p55_p9, %s414_s21, %s57_s6  }
  0x1f   : > { %s530_s9 = scalar_select %p29_p12, %s426_s24, %s31_s30  }
  0x20   : > { %p532_p0 = por %p68_p11, %p67_p10  ;;  %p74_p1 = scmp.eq.s32.totalorder %s215_s26, 15 }
  0x21   : > { %p239_p3 = scmp.lt.s32.totalorder %s430_s0, 16  ;;  %s94_s12 = sand.u32 1, %s426_s24  }
  0x22   : > { %s661_s10 = scalar_select %p532_p0, 1, 0 }
  0x23   : > { %p536_p2 = por %p74_p1, %p73_p13  ;;  %p549_p4 = pnand %p239_p3, %p510_p7 }
  0x24   : > { %s223_s13 = scalar_select %p510_p7, [#allocation3], [#allocation8] }
  0x25   : > { %s662_s11 = scalar_select %p536_p2, 1, 0 }
  0x26   : > { %s224_s14 = scalar_select %p510_p7, %s430_s0, 0 }
  0x27   : > { %s676_s13 = smov (!%p239_p3, %s223_s13), [#allocation9]  ;;  %p219_p5 = scmp.ge.s32.totalorder %s430_s0, 1 }
  0x28   : > { %s678_s14 = smov (!%p239_p3, %s224_s14), 0  ;;  %s97_s17 = scalar_lea.vmem [#allocation4], %s94_s12 }
  0x29   : > { %s98_s16 = sld [smem:[%s676_s13 + %s678_s14]]  ;;  %s105_s18 = sshll.u32 %s97_s17, 4  ;;  %s559_s18 = int_to_ptr.vmem [resolvable:$true] %s105_s18 }
  0x2a   : > { %p110_p6 = scmp.lt.s32.totalorder %s430_s0, 17  ;;  %s95_s3 = scalar_lea.sflag [#allocation5], %s94_s12 }
  0x2b   : > { %p310_p10 = pneg %p549_p4  ;;  %s313_s13 = scalar_lea.hbm %s655_s1, 2048 }
  0x2c   : > { %p555_p9 = pnand %p219_p5, %p110_p6 }
  0x2f   : > { %s218_s26 = sshll.u32 %s98_s16, 4 }
  0x30   : > { %s564_s30 = scalar_lea.hbm %s655_s1, %s218_s26 }
  0x31   : > { %s308_s4 = scalar_lea.hbm %s564_s30, 16  ;;  %p314_p13 = scmp.lt.u32.totalorder %s564_s30, %s655_s1 }
  0x32   : > { %p309_p7 = scmp.ne.s32.totalorder %s564_s30, %s308_s4  ;;  %p315_p1 = scmp.lt.u32.totalorder %s313_s13, %s308_s4 }
  0x33   : > { %p317_p5 = scmp.lt.u32.totalorder %s308_s4, %s564_s30 }
  0x34   : > { %p311_p11 = pnand %p310_p10, %p309_p7  ;;  %p316_p3 = por %p315_p1, %p314_p13 }
  0x36   : > { %p312_p12 = pneg %p311_p11  ;;  %p318_p6 = por %p317_p5, %p316_p3 }
  0x38   : > { %p319_p2 = pnand %p318_p6, %p312_p12 }
  0x3a   : > { %322 = shalt.err (!%p319_p2)
}
  0x3b   : > { %s323_s12 = scalar_lea.vmem %s559_s18, 16  ;;  %s433_s17 = smov [#allocation4]  }
  0x3c   : > { %p324_p7 = scmp.ne.s32.totalorder %s559_s18, %s323_s12  ;;  %s328_s26 = sshll.u32 %s433_s17, 4  ;;  %s329_s26 = int_to_ptr.vmem [resolvable:$false] %s328_s26 }
  0x3d   : > { %s330_s28 = scalar_lea.vmem %s329_s26, 32  ;;  %p331_p8 = scmp.lt.s32.totalorder %s559_s18, %s329_s26 }
  0x3e   : > { %p326_p11 = pnand %p324_p7, %p310_p10  ;;  %p332_p13 = scmp.lt.s32.totalorder %s330_s28, %s323_s12 }
  0x40   : > { %p327_p0 = pneg %p326_p11  ;;  %p333_p1 = por %p332_p13, %p331_p8 }
  0x42   : > { %p334_p3 = pnand %p333_p1, %p327_p0 }
  0x44   : > { %337 = shalt.err (!%p334_p3)
}
  0x45   : > { %234 = dma.hbm_to_vmem [thread:$0]  (!%p549_p4), %s564_s30, 16, %s559_s18, %s95_s3  }
  0x46   : > { %114 = sbr.rel (%p555_p9) target bundleno = 104 (0x68), region = 24  ;;  %s116_s29 = sand.u32 (!%p555_p9), 1, %s422_s23  }
  0x47   : > { %s117_s4 = scalar_lea.sflag (!%p555_p9), [#allocation5], %s116_s29  ;;  %s119_s6 = scalar_lea.vmem (!%p555_p9), [#allocation4], %s116_s29 }
  0x48   : > { %p665_p2 = scmp.ne.s32.totalorder (!%p555_p9), %s660_s5, 0 }
  0x4d   : > { %397 = dma.done.wait (%p665_p2), %s117_s4, 16  }
  0x4e   : > { %399 = vsyncadd (%p665_p2), %s117_s4, 4294967280  ;;  %s134_s15 = sand.u32 1, %s410_s20   ;;  %s220_s18 = sshll.u32 %s496_s25, 4  ;;  %v137_v0 = vld [vmem:[%s119_s6] sm:$0x1] }
  0x4f   : > { %s135_s7 = scalar_lea.vmem [#allocation7], %s134_s15  ;;  %s605_s3 = scalar_lea.hbm %s656_s2, %s220_s18 }
  0x50   : > { %s152_s13 = sshll.u32 %s135_s7, 4  ;;  %138 = vst [vmem:[%s135_s7] sm:$0x1] %v137_v0  ;;  %s140_s5 = scalar_lea.sflag [#allocation6], %s134_s15  ;;  %s600_s13 = int_to_ptr.vmem [resolvable:$true] %s152_s13 }
  0x51   : > { %s338_s14 = scalar_lea.vmem %s600_s13, 16  ;;  %p666_p0 = scmp.ne.s32.totalorder %s661_s10, 0 }
  0x52   : > { %p339_p8 = scmp.ne.s32.totalorder %s600_s13, %s338_s14  ;;  %s434_s16 = smov [#allocation7]  }
  0x53   : > { %s342_s25 = sshll.u32 %s434_s16, 4  ;;  %s343_s25 = int_to_ptr.vmem [resolvable:$false] %s342_s25 }
  0x54   : > { %p340_p4 = pnand %p339_p8, %p666_p0  ;;  %s344_s12 = scalar_lea.vmem %s343_s25, 32 }
  0x55   : > { %p345_p10 = scmp.lt.s32.totalorder %s600_s13, %s343_s25  ;;  %p346_p12 = scmp.lt.s32.totalorder %s344_s12, %s338_s14 }
  0x56   : > { %p341_p9 = pneg %p340_p4 }
  0x57   : > { %p347_p5 = por %p346_p12, %p345_p10 }
  0x59   : > { %p348_p6 = pnand %p347_p5, %p341_p9 }
  0x5b   : > { %351 = shalt.err (!%p348_p6)
}
  0x5c   : > { %s352_s17 = scalar_lea.hbm %s605_s3, 16  ;;  %s356_s29 = scalar_lea.hbm %s656_s2, 256 }
  0x5d   : > { %p353_p7 = scmp.ne.s32.totalorder %s605_s3, %s352_s17  ;;  %p357_p1 = scmp.lt.u32.totalorder %s605_s3, %s656_s2 }
  0x5e   : > { %p358_p3 = scmp.lt.u32.totalorder %s356_s29, %s352_s17  ;;  %p360_p8 = scmp.lt.u32.totalorder %s352_s17, %s605_s3 }
  0x5f   : > { %p354_p11 = pnand %p353_p7, %p666_p0 }
  0x60   : > { %p359_p2 = por %p358_p3, %p357_p1 }
  0x61   : > { %p355_p13 = pneg %p354_p11 }
  0x62   : > { %p361_p4 = por %p360_p8, %p359_p2 }
  0x64   : > { %p362_p9 = pnand %p361_p4, %p355_p13 }
  0x66   : > { %365 = shalt.err (!%p362_p9)
}
  0x67   : > { %227 = dma.vmem_to_hbm [thread:$0]  (%p666_p0), %s600_s13, 16, %s605_s3, %s140_s5  }
  0x68 PF: > { %p240_p10 = scmp.ge.s32.totalorder %s430_s0, 2  ;;  %s164_s15 = sand.u32 1, %s406_s19  }
  0x69   : > { %p667_p12 = scmp.ne.s32.totalorder %s662_s11, 0  ;;  %s165_s7 = scalar_lea.sflag [#allocation6], %s164_s15 }
  0x6b   : > { %p236_p5 = pnand %p240_p10, %p667_p12 }
  0x6d   : > { %401 = dma.done.wait (!%p236_p5), %s165_s7, 16  }
  0x6e   : > { %403 = vsyncadd (!%p236_p5), %s165_s7, 4294967280  ;;  %p19_p0 = scmp.ge.s32.totalorder %s500_s27, 18   ;;  %s668_s19 = smov %s410_s20 }
  0x6f   : > { %s669_s20 = smov %s414_s21  ;;  %s670_s21 = smov %s527_s8 }
  0x70   : > { %s671_s22 = smov %s422_s23  ;;  %s672_s23 = smov %s426_s24 }
  0x71   : > { %s673_s24 = smov %s530_s9  ;;  %s674_s0 = smov %s500_s27 }
  0x72   :  { %21 = sbr.rel (!%p19_p0) target bundleno = 19 (0x13), region = 69 }
  0x79   :  { %169 = vsyncpa [#allocation5], 1 }
  0x7a   :  { %171 = vsyncpa [#allocation5 + $0x1], 1 }
  0x7b   :  { %172 = vsyncpa [#allocation6], 1 }
  0x7c   :  { %174 = vsyncpa [#allocation6 + $0x1], 1 }

</bundles_post_ra>
